<compile_context>
chip_gen: v7x
topology: tpu7x:2x2x1
jax: 0.10.0
libtpu: 0.0.40
codegen_flags: <defaults>
</compile_context>

<pallas_src>
import functools

import jax
import jax.numpy as jnp
from jax import lax
from jax.experimental import pallas as pl
from jax.experimental.pallas import tpu as pltpu

_LANES = 128
_SUBLANES = 8
_MIN_PALLAS_BYTES = 16 * 1024   # below this, a kernel launch is pure overhead


def _cdiv(a, b):
    return -(-a // b)


def _round_up(a, m):
    return ((a + m - 1) // m) * m


def _target_block_bytes():
    """HBM bytes per input block.  2 inputs x 2 pipeline buffers of this size
    must fit the scoped-VMEM default: v5e 16 MiB -> 2 MiB blocks (8 MiB live);
    v6e / v7x 32 MiB -> 4 MiB blocks (16 MiB live)."""
    try:
        kind = jax.devices()[0].device_kind.lower()
    except Exception:  # defensive: unknown backend -> safe default
        kind = ""
    if "v6" in kind or "v7" in kind:
        return 4 << 20
    return 2 << 20      # safe everywhere, including v5e


def _pick_block_rows(rows, itemsize):
    """Dtype-aware block sizing: ~constant HBM bytes per DMA, rows a multiple
    of the dtype's sublane packing, and >=2 grid blocks so the 'parallel'
    grid axis can shard across v7x's two TensorCores."""
    packing = max(1, 4 // int(itemsize))           # f32:1, bf16:2, int8:4
    row_quant = _SUBLANES * packing                # 8 / 16 / 32
    max_rows = max(row_quant, _target_block_bytes() // (_LANES * int(itemsize)))
    max_rows = (max_rows // row_quant) * row_quant
    block_rows = min(max_rows, _round_up(rows, row_quant))
    if _cdiv(rows, block_rows) == 1 and rows >= 2 * row_quant:
        # Prefer two half-size blocks over one block that swallows the array.
        block_rows = _round_up(_cdiv(rows, 2), row_quant)
    return block_rows


def _abs_pow(v, n):
    """|v| ** n, special-casing integer n to stay on the VPU (no EUP pow)."""
    if float(n) == int(n) and int(n) > 0:
        ni = int(n)
        if ni % 2 == 0:
            return lax.integer_pow(v, ni)          # even power: abs is implicit
        return lax.integer_pow(jnp.abs(v), ni)
    return jnp.power(jnp.abs(v), jnp.float32(n))


def _partial_sum(v):
    """(block_rows, 128) f32 -> (8, 128) partial sum using only VPU adds.
    The (br//8, 8, 128) reshape lands exactly on (8,128) vreg tiles."""
    br = v.shape[0]
    return jnp.sum(v.reshape(br // _SUBLANES, _SUBLANES, _LANES), axis=0)


def _tail_keep_mask(shape, valid_rows_last):
    """Keep-mask zeroing the garbage rows of the clipped last grid block."""
    is_last = pl.program_id(0) == pl.num_programs(0) - 1
    bound = jnp.where(is_last, valid_rows_last, shape[0])
    row = lax.broadcasted_iota(jnp.int32, shape, 0)
    return row < bound


# ---------------------------------------------------------------------------
# Reduction kernels: per-block (8,128) partial sums of |x-y|^n (and |y|^n).
# Final scalar sum + /n + /total happens on the tiny partials in JAX.
# ---------------------------------------------------------------------------
def _reduce_kernel_norm(x_ref, y_ref, loss_part_ref, norm_part_ref, *,
                        n, valid_rows_last):
    x = x_ref[...].astype(jnp.float32)
    y = y_ref[...].astype(jnp.float32)
    d = _abs_pow(x - y, n)
    yn = _abs_pow(y, n)
    if valid_rows_last is not None:        # ragged last block: mask garbage rows
        keep = _tail_keep_mask(x.shape, valid_rows_last)
        d = jnp.where(keep, d, 0.0)
        yn = jnp.where(keep, yn, 0.0)
    loss_part_ref[...] = _partial_sum(d)
    norm_part_ref[...] = _partial_sum(yn)


def _reduce_kernel_nonorm(x_ref, y_ref, loss_part_ref, *, n, valid_rows_last):
    x = x_ref[...].astype(jnp.float32)
    y = y_ref[...].astype(jnp.float32)
    d = _abs_pow(x - y, n)
    if valid_rows_last is not None:
        d = jnp.where(_tail_keep_mask(x.shape, valid_rows_last), d, 0.0)
    loss_part_ref[...] = _partial_sum(d)


# ---------------------------------------------------------------------------
# Hard-mining streaming kernel: |x - y| in the INPUT dtype.  top-k of |x-y|
# equals top-k of |x-y|^n/n (n>0), so pow + f32 widening is deferred to the
# k selected elements.  Output writes are clipped to the array, so no mask.
# ---------------------------------------------------------------------------
def _absdiff_kernel(x_ref, y_ref, out_ref):
    out_ref[...] = jnp.abs(x_ref[...] - y_ref[...])


def _to_lane2d(a):
    """Flatten to (rows, 128) in the native dtype.  Free (layout-preserving
    reshape) when size % 128 == 0; otherwise zero-pad by <128 elements."""
    flat = jnp.ravel(a)
    rem = flat.shape[0] % _LANES
    if rem:
        # TODO(synk): a lane-ragged tail (<128 elems) cannot be expressed as a
        # (rows, 128) BlockSpec; this pad costs one HBM copy in that rare case.
        flat = jnp.pad(flat, (0, _LANES - rem))
    return flat.reshape(-1, _LANES)


def _denoise_loss_ref(x, y, *, n=2, hard_mining=0.0, norm=False):
    """Plain-JAX implementation mirroring the PyTorch module.  Also used as
    the small-input bypass (a 1-2 block pallas_call is pure overhead)."""
    n_f = float(n)
    loss = jnp.power(jnp.abs(x - y), n_f) / n_f
    if hard_mining > 0:
        loss = loss.reshape(-1)
        k = max(int(loss.shape[0] * hard_mining), 1)
        loss, idcs = lax.top_k(loss, k)
        y = y.reshape(-1)[idcs]
    out = jnp.mean(loss)
    if norm:
        out = out / jnp.mean(jnp.power(jnp.abs(y), n_f))
    return out


def denoise_loss(x, y, *, n=2, hard_mining=0.0, norm=False):
    """Pallas implementation of DenoiseLoss.forward.  Returns a scalar."""
    assert x.shape == y.shape
    assert 0.0 <= hard_mining <= 1.0
    total = 1
    for s in x.shape:
        total *= int(s)
    itemsize = int(jnp.dtype(x.dtype).itemsize)

    # Tiny inputs: skip the kernel entirely (also avoids a 1-block grid that
    # would leave one v7x TensorCore idle).
    if total * itemsize < _MIN_PALLAS_BYTES:
        return _denoise_loss_ref(x, y, n=n, hard_mining=hard_mining, norm=norm)

    x2d = _to_lane2d(x)
    y2d = _to_lane2d(y)
    rows = x2d.shape[0]
    block_rows = _pick_block_rows(rows, itemsize)
    num_blocks = int(_cdiv(rows, block_rows))
    tail = rows - (num_blocks - 1) * block_rows
    valid_rows_last = None if tail == block_rows else tail   # Python constant

    grid = (num_blocks,)
    in_block = pl.BlockSpec((block_rows, _LANES), lambda i: (i, 0))
    n_f = float(n)

    if hard_mining > 0:
        # Streaming |x-y| pass in Pallas; selection stays in JAX.
        # TODO(synk): full-tensor lax.top_k (sort-class) has no clean Pallas
        # equivalent; a per-block prefilter could shrink its input further.
        diff2d = pl.pallas_call(
            _absdiff_kernel,
            out_shape=jax.ShapeDtypeStruct((rows, _LANES), x2d.dtype),
            grid_spec=pltpu.PrefetchScalarGridSpec(
                num_scalar_prefetch=0,
                grid=grid,
                in_specs=[in_block, in_block],
                out_specs=pl.BlockSpec((block_rows, _LANES), lambda i: (i, 0)),
            ),
            compiler_params=pltpu.CompilerParams(
                dimension_semantics=("parallel",)),
        )(x2d, y2d)

        diff_flat = diff2d.reshape(-1)
        if diff_flat.shape[0] != total:           # drop lane padding, if any
            diff_flat = diff_flat[:total]
        k = max(int(total * hard_mining), 1)
        top_d, idcs = lax.top_k(diff_flat, k)
        loss = jnp.mean(_abs_pow(top_d.astype(jnp.float32), n)) / n_f
        if norm:
            y_sel = jnp.ravel(y).astype(jnp.float32)[idcs]
            loss = loss / jnp.mean(_abs_pow(y_sel, n))
        return loss

    # hard_mining == 0: fused elementwise + (8,128) partial-sum reduction.
    part_shape = jax.ShapeDtypeStruct((num_blocks * _SUBLANES, _LANES),
                                      jnp.float32)
    part_spec = pl.BlockSpec((_SUBLANES, _LANES), lambda i: (i, 0))

    if norm:
        kernel = functools.partial(_reduce_kernel_norm, n=n,
                                   valid_rows_last=valid_rows_last)
        out_shape = (part_shape, part_shape)
        out_specs = [part_spec,
                     pl.BlockSpec((_SUBLANES, _LANES), lambda i: (i, 0))]
    else:
        kernel = functools.partial(_reduce_kernel_nonorm, n=n,
                                   valid_rows_last=valid_rows_last)
        out_shape = part_shape
        out_specs = part_spec

    res = pl.pallas_call(
        kernel,
        out_shape=out_shape,
        grid_spec=pltpu.PrefetchScalarGridSpec(
            num_scalar_prefetch=0,
            grid=grid,
            in_specs=[in_block, in_block],
            out_specs=out_specs,
        ),
        compiler_params=pltpu.CompilerParams(
            dimension_semantics=("parallel",)),
    )(x2d, y2d)

    if norm:
        loss_parts, norm_parts = res
        loss = jnp.sum(loss_parts) / (total * n_f)
        return loss / (jnp.sum(norm_parts) / total)
    return jnp.sum(res) / (total * n_f)


if __name__ == "__main__":
    key = jax.random.PRNGKey(0)
    kx, ky = jax.random.split(key)

    # NCHW activations (guided-denoiser style), small but above the bypass.
    x = jax.random.normal(kx, (2, 4, 32, 32), dtype=jnp.float32)
    y = jax.random.normal(ky, (2, 4, 32, 32), dtype=jnp.float32)

    configs = [
        dict(n=2, hard_mining=0.0, norm=True),    # default config
        dict(n=2, hard_mining=0.0, norm=False),   # single-output reduce kernel
        dict(n=3, hard_mining=0.0, norm=True),    # odd-integer power path
        dict(n=2, hard_mining=0.25, norm=True),   # |x-y| kernel + JAX top-k
    ]
    for cfg in configs:
        out = jax.block_until_ready(denoise_loss(x, y, **cfg))
        ref = _denoise_loss_ref(x, y, **cfg)
        assert jnp.allclose(out, ref, rtol=1e-5, atol=1e-6), (cfg, out, ref)

    # Ragged block tail (rows not a multiple of block_rows): exercises the
    # in-kernel tail mask, with zero wrapper-side padding.
    xr = jax.random.normal(kx, (2, 4, 26, 32), dtype=jnp.float32)
    yr = jax.random.normal(ky, (2, 4, 26, 32), dtype=jnp.float32)
    out = jax.block_until_ready(denoise_loss(xr, yr, n=2, norm=True))
    ref = _denoise_loss_ref(xr, yr, n=2, hard_mining=0.0, norm=True)
    assert jnp.allclose(out, ref, rtol=1e-5, atol=1e-6), (out, ref)

    # Lane-ragged size (total % 128 != 0): exercises the rare pad fallback.
    xq = jax.random.normal(kx, (2, 3, 29, 31), dtype=jnp.float32)
    yq = jax.random.normal(ky, (2, 3, 29, 31), dtype=jnp.float32)
    out = jax.block_until_ready(denoise_loss(xq, yq, n=2, norm=True))
    ref = _denoise_loss_ref(xq, yq, n=2, hard_mining=0.0, norm=True)
    assert jnp.allclose(out, ref, rtol=1e-5, atol=1e-6), (out, ref)

    # bf16 inputs: dtype-aware block sizing, in-kernel f32 accumulation.
    xb = x.astype(jnp.bfloat16)
    yb = y.astype(jnp.bfloat16)
    out = jax.block_until_ready(denoise_loss(xb, yb, n=2, norm=True))
    ref = _denoise_loss_ref(xb.astype(jnp.float32), yb.astype(jnp.float32),
                            n=2, hard_mining=0.0, norm=True)
    assert jnp.allclose(out, ref, rtol=1e-4, atol=1e-5), (out, ref)

    # Tiny input takes the plain-JAX bypass (no kernel launch).
    xt = jax.random.normal(kx, (2, 4, 8, 8), dtype=jnp.float32)
    yt = jax.random.normal(ky, (2, 4, 8, 8), dtype=jnp.float32)
    out = jax.block_until_ready(denoise_loss(xt, yt, n=2, norm=True))
    ref = _denoise_loss_ref(xt, yt, n=2, hard_mining=0.0, norm=True)
    assert jnp.allclose(out, ref, rtol=1e-5, atol=1e-6), (out, ref)

    print("KERNEL_OK")
</pallas_src>

<mosaic_0001>
module attributes {stable_mosaic.version = 11 : i64} {
  func.func @_reduce_kernel_norm(%arg0: i32, %arg1: memref<32x128xf32, #tpu.memory_space<vmem>>, %arg2: memref<32x128xf32, #tpu.memory_space<vmem>>, %arg3: memref<8x128xf32, #tpu.memory_space<vmem>>, %arg4: memref<8x128xf32, #tpu.memory_space<vmem>>) attributes {dimension_semantics = [#tpu.dimension_semantics<parallel>], iteration_bounds = array<i64: 2>, scalar_prefetch = 0 : i64, scratch_operands = 0 : i64, tpu.core_type = #tpu.core_type<tc>, window_params = [{transform_indices = @transform_0, window_bounds = array<i64: 32, 128>}, {transform_indices = @transform_1, window_bounds = array<i64: 32, 128>}, {transform_indices = @transform_2, window_bounds = array<i64: 8, 128>}, {transform_indices = @transform_3, window_bounds = array<i64: 8, 128>}]} {
    %c0 = arith.constant 0 : index
    %c0_0 = arith.constant 0 : index
    %0 = vector.load %arg1[%c0, %c0_0] : memref<32x128xf32, #tpu.memory_space<vmem>>, vector<32x128xf32>
    %c0_1 = arith.constant 0 : index
    %c0_2 = arith.constant 0 : index
    %1 = vector.load %arg2[%c0_1, %c0_2] : memref<32x128xf32, #tpu.memory_space<vmem>>, vector<32x128xf32>
    %2 = arith.subf %0, %1 : vector<32x128xf32>
    %3 = arith.mulf %2, %2 : vector<32x128xf32>
    %4 = arith.mulf %1, %1 : vector<32x128xf32>
    %5 = vector.shape_cast %3 : vector<32x128xf32> to vector<4x8x128xf32>
    %cst = arith.constant dense<0.000000e+00> : vector<8x128xf32>
    %6 = vector.multi_reduction <add>, %5, %cst [0] : vector<4x8x128xf32> to vector<8x128xf32>
    %c0_3 = arith.constant 0 : index
    %c0_4 = arith.constant 0 : index
    %7 = vector.load %arg3[%c0_3, %c0_4] : memref<8x128xf32, #tpu.memory_space<vmem>>, vector<8x128xf32>
    tpu.vector_store %arg3[%c0_3, %c0_4], %6 {strides = array<i32>} : memref<8x128xf32, #tpu.memory_space<vmem>>, vector<8x128xf32>,
    %8 = vector.shape_cast %4 : vector<32x128xf32> to vector<4x8x128xf32>
    %cst_5 = arith.constant dense<0.000000e+00> : vector<8x128xf32>
    %9 = vector.multi_reduction <add>, %8, %cst_5 [0] : vector<4x8x128xf32> to vector<8x128xf32>
    %c0_6 = arith.constant 0 : index
    %c0_7 = arith.constant 0 : index
    %10 = vector.load %arg4[%c0_6, %c0_7] : memref<8x128xf32, #tpu.memory_space<vmem>>, vector<8x128xf32>
    tpu.vector_store %arg4[%c0_6, %c0_7], %9 {strides = array<i32>} : memref<8x128xf32, #tpu.memory_space<vmem>>, vector<8x128xf32>,
    return
  }
  func.func @transform_0(%arg0: i32) -> (i32, i32) {
    %c0_i32 = arith.constant 0 : i32
    %c0_i32_0 = arith.constant 0 : i32
    return %arg0, %c0_i32 : i32, i32
  }
  func.func @transform_1(%arg0: i32) -> (i32, i32) {
    %c0_i32 = arith.constant 0 : i32
    %c0_i32_0 = arith.constant 0 : i32
    return %arg0, %c0_i32 : i32, i32
  }
  func.func @transform_2(%arg0: i32) -> (i32, i32) {
    %c0_i32 = arith.constant 0 : i32
    %c0_i32_0 = arith.constant 0 : i32
    return %arg0, %c0_i32 : i32, i32
  }
  func.func @transform_3(%arg0: i32) -> (i32, i32) {
    %c0_i32 = arith.constant 0 : i32
    %c0_i32_0 = arith.constant 0 : i32
    return %arg0, %c0_i32 : i32, i32
  }
}

</mosaic_0001>

<bundles_post_ra>
// kernel: tpu_custom_call.1
= control target key start
LH: loop header
LB: loop body
LE: loop exit
PB: predicated region body
PF: predicated region fallthrough
CT: control target
= control target key end

     0   :  { %9 = vsyncpa [#allocation3], 0  ;;  %s952_s0 = inlined_call_operand.hbm [shape: f32[64,128], index: 0, kind: input, shape index: {}]   ;;  %s953_s1 = inlined_call_operand.hbm [shape: f32[64,128], index: 1, kind: input, shape index: {}]   ;;  %s954_s2 = inlined_call_operand.hbm [shape: f32[16,128], index: 2, kind: output, shape index: {0}]   ;;  %s955_s3 = inlined_call_operand.hbm [shape: f32[16,128], index: 3, kind: output, shape index: {1}]  }
   0x1   :  { %11 = vsyncpa [#allocation3 + $0x1], 0 }
   0x2   :  { %12 = vsyncpa [#allocation6], 0 }
   0x3   :  { %14 = vsyncpa [#allocation6 + $0x1], 0 }
   0x4   :  { %15 = vsyncpa [#allocation4], 0 }
   0x5   :  { %17 = vsyncpa [#allocation4 + $0x1], 0 }
   0x6   :  { %18 = vsyncpa [#allocation9], 0 }
   0x7   :  { %20 = vsyncpa [#allocation9 + $0x1], 0  ;;  %s697_s12 = smov 0   ;;  %s699_s13 = smov 0  }
   0x8   :  { %s701_s14 = smov 0   ;;  %s703_s15 = smov 0  }
   0x9 LB: > { %s718_s16 = sadd.s32 4294967295, %s669_s15   ;;  %s427_s17 = sadd.s32 4294967294, %s669_s15   ;;  %s669_s15 = sphi %s703_s15, %s971_s15   ;;  %s665_s14 = sphi %s701_s14, %s970_s14   ;;  %s661_s13 = sphi %s699_s13, %s969_s13   ;;  %s657_s12 = sphi %s697_s12, %s968_s12  }
   0xa   : > { %s722_s18 = sadd.s32 1, %s669_s15   ;;  %s33_s19 = sadd.s32 1, %s665_s14 }
   0xb   : > { %s30_s20 = ssub.s32 %s669_s15, %s722_s18  ;;  %p40_p0 = scmp.ne.s32.totalorder %s665_s14, %s661_s13 }
   0xc   : > { %p31_p1 = scmp.eq.s32.totalorder %s30_s20, 0  ;;  %p41_p2 = scmp.eq.s32.totalorder %s669_s15, 0 }
   0xd   : > { %p46_p3 = scmp.ne.s32.totalorder %s661_s13, %s657_s12  ;;  %p47_p4 = scmp.eq.s32.totalorder %s718_s16, 0 }
   0xe   : > { %s734_s21 = scalar_select %p31_p1, %s665_s14, %s33_s19  }
   0xf   : > { %p736_p5 = por %p41_p2, %p40_p0  ;;  %p740_p6 = por %p47_p4, %p46_p3 }
  0x10   : > { %p96_p7 = scmp.eq.s32.totalorder %s718_s16, 1  ;;  %p102_p8 = scmp.eq.s32.totalorder %s427_s17, 1 }
  0x11   : > { %s959_s23 = scalar_select %p740_p6, 1, 0 }
  0x12   : > { %p471_p10 = scmp.lt.s32.totalorder %s669_s15, 2  ;;  %p747_p11 = por %p96_p7, %p40_p0 }
  0x13   : > { %p751_p12 = por %p102_p8, %p46_p3  ;;  %s756_s26 = sand.u32 1, %s665_s14  }
  0x14   : > { %s960_s24 = scalar_select %p747_p11, 1, 0 }
  0x15   : > { %s961_s25 = scalar_select %p751_p12, 1, 0 }
  0x16   : > { %s447_s27 = sshll.u32 %s669_s15, 9  ;;  %s430_s28 = sshll.u32 %s756_s26, 5 }
  0x17   : > { %s765_s4 = scalar_lea.hbm %s952_s0, %s447_s27  ;;  %s152_s5 = scalar_lea.vmem [#allocation2], %s430_s28 }
  0x18   : > { %s159_s6 = sshll.u32 %s152_s5, 4  ;;  %p771_p13 = pnand %p471_p10, %p736_p5  ;;  %s775_s6 = int_to_ptr.vmem [resolvable:$true] %s159_s6 }
  0x19   : > { %s149_s8 = scalar_lea.sflag [#allocation3], %s756_s26  ;;  %s507_s9 = scalar_lea.hbm %s765_s4, 512 }
  0x1a   : > { %p508_p0 = scmp.ne.s32.totalorder %s765_s4, %s507_s9  ;;  %p509_p1 = pneg %p771_p13 }
  0x1b   : > { %s512_s17 = scalar_lea.hbm %s952_s0, 1024  ;;  %p513_p4 = scmp.lt.u32.totalorder %s765_s4, %s952_s0 }
  0x1c   : > { %p510_p2 = pnand %p509_p1, %p508_p0  ;;  %p514_p5 = scmp.lt.u32.totalorder %s512_s17, %s507_s9 }
  0x1d   : > { %p516_p8 = scmp.lt.u32.totalorder %s507_s9, %s765_s4 }
  0x1e   : > { %p511_p3 = pneg %p510_p2  ;;  %p515_p7 = por %p514_p5, %p513_p4 }
  0x20   : > { %p517_p10 = por %p516_p8, %p515_p7 }
  0x22   : > { %p518_p9 = pnand %p517_p10, %p511_p3 }
  0x24   : > { %521 = shalt.err (!%p518_p9)
}
  0x25   : > { %s522_s22 = scalar_lea.vmem %s775_s6, 512  ;;  %s671_s29 = smov [#allocation2]  }
  0x26   : > { %p523_p0 = scmp.ne.s32.totalorder %s775_s6, %s522_s22  ;;  %s527_s30 = sshll.u32 %s671_s29, 4  ;;  %s528_s30 = int_to_ptr.vmem [resolvable:$false] %s527_s30 }
  0x27   : > { %s529_s5 = scalar_lea.vmem %s528_s30, 1024  ;;  %p530_p11 = scmp.lt.s32.totalorder %s775_s6, %s528_s30 }
  0x28   : > { %p525_p2 = pnand %p523_p0, %p509_p1  ;;  %p531_p4 = scmp.lt.s32.totalorder %s529_s5, %s522_s22 }
  0x2a   : > { %p526_p12 = pneg %p525_p2  ;;  %p532_p5 = por %p531_p4, %p530_p11 }
  0x2c   : > { %p533_p7 = pnand %p532_p5, %p526_p12 }
  0x2e   : > { %536 = shalt.err (!%p533_p7)
}
  0x2f   : > { %s672_s9 = smov 128   ;;  %s673_s10 = smov 8  }
  0x30   : > { %460 = dma.hbm_to_vmem [thread:$0]  (!%p771_p13), %s765_s4, 512, %s775_s6, %s149_s8, %s672_s9, %s672_s9, %s673_s10  }
  0x31   : > { %p436_p9 = scmp.ge.s32.totalorder %s669_s15, 1  ;;  %p188_p11 = scmp.lt.s32.totalorder %s669_s15, 3 }
  0x32   : > { %s819_s20 = scalar_lea.hbm %s953_s1, %s447_s27  ;;  %s173_s22 = scalar_lea.vmem [#allocation5], %s430_s28 }
  0x33   : > { %p810_p12 = pnand %p436_p9, %p188_p11  ;;  %s180_s29 = sshll.u32 %s173_s22, 4  ;;  %s823_s29 = int_to_ptr.vmem [resolvable:$true] %s180_s29 }
  0x34   : > { %s170_s4 = scalar_lea.sflag [#allocation6], %s756_s26  ;;  %s537_s6 = scalar_lea.hbm %s819_s20, 512 }
  0x35   : > { %p538_p3 = scmp.ne.s32.totalorder %s819_s20, %s537_s6  ;;  %s542_s27 = scalar_lea.hbm %s953_s1, 1024 }
  0x36   : > { %p543_p0 = scmp.lt.u32.totalorder %s819_s20, %s953_s1  ;;  %p544_p2 = scmp.lt.u32.totalorder %s542_s27, %s537_s6 }
  0x37   : > { %p540_p8 = pnand %p538_p3, %p509_p1  ;;  %p546_p5 = scmp.lt.u32.totalorder %s537_s6, %s819_s20 }
  0x38   : > { %p545_p4 = por %p544_p2, %p543_p0 }
  0x39   : > { %p541_p10 = pneg %p540_p8 }
  0x3a   : > { %p547_p7 = por %p546_p5, %p545_p4 }
  0x3c   : > { %p548_p9 = pnand %p547_p7, %p541_p10 }
  0x3e   : > { %551 = shalt.err (!%p548_p9)
}
  0x3f   : > { %s552_s28 = scalar_lea.vmem %s823_s29, 512  ;;  %s674_s19 = smov [#allocation5]  }
  0x40   : > { %p553_p11 = scmp.ne.s32.totalorder %s823_s29, %s552_s28  ;;  %s557_s22 = sshll.u32 %s674_s19, 4  ;;  %s558_s22 = int_to_ptr.vmem [resolvable:$false] %s557_s22 }
  0x41   : > { %s559_s8 = scalar_lea.vmem %s558_s22, 1024  ;;  %p560_p6 = scmp.lt.s32.totalorder %s823_s29, %s558_s22 }
  0x42   : > { %p555_p3 = pnand %p553_p11, %p509_p1  ;;  %p561_p0 = scmp.lt.s32.totalorder %s559_s8, %s552_s28 }
  0x44   : > { %p556_p8 = pneg %p555_p3  ;;  %p562_p2 = por %p561_p0, %p560_p6 }
  0x46   : > { %p563_p4 = pnand %p562_p2, %p556_p8 }
  0x48   : > { %566 = shalt.err (!%p563_p4)
}
  0x49   : > { %463 = dma.hbm_to_vmem [thread:$0]  (!%p771_p13), %s819_s20, 512, %s823_s29, %s170_s4, %s672_s9, %s672_s9, %s673_s10  }
  0x4a   : > { %192 = sbr.rel (%p810_p12) target bundleno = 135 (0x87), region = 28  ;;  %s857_s6 = sand.u32 (!%p810_p12), 1, %s661_s13  }
  0x4b   : > { %s437_s30 = sshll.u32 (!%p810_p12), %s857_s6, 5  ;;  %s195_s27 = scalar_lea.sflag (!%p810_p12), [#allocation3], %s857_s6 }
  0x4c   : > { %s198_s7 = scalar_lea.vmem (!%p810_p12), [#allocation2], %s437_s30  ;;  %p964_p6 = scmp.ne.s32.totalorder (!%p810_p12), %s959_s23, 0 }
  0x51   : > { %640 = dma.done.wait (%p964_p6), %s195_s27, 512  }
  0x52   : > { %642 = vsyncadd (%p964_p6), %s195_s27, 4294966784  ;;  %s204_s26 = scalar_lea.sflag [#allocation6], %s857_s6  ;;  %s207_s9 = scalar_lea.vmem [#allocation5], %s437_s30 }
  0x53   : > { %644 = dma.done.wait (%p964_p6), %s204_s26, 512  }
  0x54   : > { %646 = vsyncadd (%p964_p6), %s204_s26, 4294966784  ;;  %s439_s10 = sshll.u32 %s857_s6, 3  ;;  %v242_v0 = vld [vmem:[%s198_s7] sm:$0xff]  ;;  %v243_v1 = vld [vmem:[%s198_s7 + $0x8] sm:$0xff]  ;;  %s443_s20 = sshll.u32 %s718_s16, 7 }
  0x55   : > { %v244_v2 = vld [vmem:[%s198_s7 + $0x10] sm:$0xff]  ;;  %v245_v3 = vld [vmem:[%s198_s7 + $0x18] sm:$0xff]  ;;  %v246_v4 = vld [vmem:[%s207_s9] sm:$0xff]  ;;  %s239_s23 = scalar_lea.vmem [#allocation8], %s439_s10  ;;  %s872_s29 = scalar_lea.vmem [#allocation7], %s439_s10 }
  0x56   : > { %v247_v5 = vld [vmem:[%s207_s9 + $0x8] sm:$0xff]  ;;  %v248_v6 = vld [vmem:[%s207_s9 + $0x10] sm:$0xff]  ;;  %v249_v7 = vld [vmem:[%s207_s9 + $0x18] sm:$0xff]  ;;  %v250_v8 = vsub.f32 %v242_v0, %v246_v4  ;;  %v258_v10 = vmul.f32 %v246_v4, %v246_v4  ;;  %s302_s11 = sshll.u32 %s239_s23, 4  ;;  %s289_s4 = sshll.u32 %s872_s29, 4  ;;  %s875_s11 = int_to_ptr.vmem [resolvable:$true] %s302_s11  ;;  %s882_s4 = int_to_ptr.vmem [resolvable:$true] %s289_s4 }
  0x57   : > { %v251_v9 = vsub.f32 %v243_v1, %v247_v5  ;;  %v259_v11 = vmul.f32 %v247_v5, %v247_v5  ;;  %v252_v12 = vsub.f32 %v244_v2, %v248_v6  ;;  %v253_v13 = vsub.f32 %v245_v3, %v249_v7  ;;  %s880_s28 = scalar_lea.hbm %s955_s3, %s443_s20  ;;  %s887_s22 = scalar_lea.hbm %s954_s2, %s443_s20 }
  0x58   : > { %v260_v14 = vmul.f32 %v248_v6, %v248_v6  ;;  %v254_v15 = vmul.f32 %v250_v8, %v250_v8  ;;  %v261_v17 = vmul.f32 %v249_v7, %v249_v7  ;;  %s276_s8 = scalar_lea.sflag [#allocation9], %s857_s6  ;;  %s567_s30 = scalar_lea.vmem %s875_s11, 128 }
  0x59   : > { %v255_v16 = vmul.f32 %v251_v9, %v251_v9  ;;  %v266_v18 = vadd.f32 %v259_v11, %v258_v10  ;;  %v256_v19 = vmul.f32 %v252_v12, %v252_v12  ;;  %v257_v20 = vmul.f32 %v253_v13, %v253_v13  ;;  %p568_p13 = scmp.ne.s32.totalorder %s875_s11, %s567_s30  ;;  %p965_p1 = scmp.ne.s32.totalorder %s960_s24, 0 }
  0x5a   : > { %s675_s27 = smov [#allocation8]  }
  0x5b   : > { %v262_v21 = vadd.f32 %v255_v16, %v254_v15  ;;  %v267_v22 = vadd.f32 %v266_v18, %v260_v14  ;;  %p569_p12 = pnand %p568_p13, %p965_p1  ;;  %s571_s7 = sshll.u32 %s675_s27, 4  ;;  %s572_s7 = int_to_ptr.vmem [resolvable:$false] %s571_s7 }
  0x5c   : > { %s573_s26 = scalar_lea.vmem %s572_s7, 256  ;;  %p574_p5 = scmp.lt.s32.totalorder %s875_s11, %s572_s7 }
  0x5d   : > { %v263_v23 = vadd.f32 %v262_v21, %v256_v19  ;;  %v268_v24 = vadd.f32 %v267_v22, %v261_v17  ;;  %p570_p10 = pneg %p569_p12  ;;  %p575_p7 = scmp.lt.s32.totalorder %s573_s26, %s567_s30 }
  0x5f   : > { %v264_v25 = vadd.f32 %v263_v23, %v257_v20  ;;  %269 = vst [vmem:[%s239_s23] sm:$0xff] %v268_v24  ;;  %p576_p9 = por %p575_p7, %p574_p5 }
  0x61   : > { %p577_p11 = pnand %p576_p9, %p570_p10 }
  0x63   : > { %580 = shalt.err (!%p577_p11)
}
  0x64   : > { %s581_s9 = scalar_lea.hbm %s880_s28, 128  ;;  %s585_s20 = scalar_lea.hbm %s955_s3, 256 }
  0x65   : > { %p582_p3 = scmp.ne.s32.totalorder %s880_s28, %s581_s9  ;;  %p586_p2 = scmp.lt.u32.totalorder %s880_s28, %s955_s3 }
  0x66   : > { %p587_p4 = scmp.lt.u32.totalorder %s585_s20, %s581_s9  ;;  %p589_p13 = scmp.lt.u32.totalorder %s581_s9, %s880_s28 }
  0x67   : > { %p583_p8 = pnand %p582_p3, %p965_p1 }
  0x68   : > { %p588_p6 = por %p587_p4, %p586_p2 }
  0x69   : > { %p584_p0 = pneg %p583_p8 }
  0x6a   : > { %p590_p12 = por %p589_p13, %p588_p6 }
  0x6c   : > { %p591_p10 = pnand %p590_p12, %p584_p0 }
  0x6e   : > { %594 = shalt.err (!%p591_p10)
}
  0x6f   : > { %454 = dma.vmem_to_hbm [thread:$0]  (%p965_p1), %s875_s11, 128, %s880_s28, %s276_s8   ;;  %265 = vst [vmem:[%s872_s29] sm:$0xff] %v264_v25 }
  0x70   : > { %s271_s16 = scalar_lea.sflag [#allocation4], %s857_s6  ;;  %s595_s19 = scalar_lea.vmem %s882_s4, 128 }
  0x71   : > { %p596_p5 = scmp.ne.s32.totalorder %s882_s4, %s595_s19  ;;  %s676_s30 = smov [#allocation7]  }
  0x72   : > { %s599_s27 = sshll.u32 %s676_s30, 4  ;;  %s600_s27 = int_to_ptr.vmem [resolvable:$false] %s599_s27 }
  0x73   : > { %p597_p7 = pnand %p596_p5, %p965_p1  ;;  %s601_s7 = scalar_lea.vmem %s600_s27, 256 }
  0x74   : > { %p602_p11 = scmp.lt.s32.totalorder %s882_s4, %s600_s27  ;;  %p603_p3 = scmp.lt.s32.totalorder %s601_s7, %s595_s19 }
  0x75   : > { %p598_p9 = pneg %p597_p7 }
  0x76   : > { %p604_p8 = por %p603_p3, %p602_p11 }
  0x78   : > { %p605_p0 = pnand %p604_p8, %p598_p9 }
  0x7a   : > { %608 = shalt.err (!%p605_p0)
}
  0x7b   : > { %s609_s6 = scalar_lea.hbm %s887_s22, 128  ;;  %s613_s28 = scalar_lea.hbm %s954_s2, 256 }
  0x7c   : > { %p610_p2 = scmp.ne.s32.totalorder %s887_s22, %s609_s6  ;;  %p614_p13 = scmp.lt.u32.totalorder %s887_s22, %s954_s2 }
  0x7d   : > { %p615_p12 = scmp.lt.u32.totalorder %s613_s28, %s609_s6  ;;  %p617_p5 = scmp.lt.u32.totalorder %s609_s6, %s887_s22 }
  0x7e   : > { %p611_p4 = pnand %p610_p2, %p965_p1 }
  0x7f   : > { %p616_p10 = por %p615_p12, %p614_p13 }
  0x80   : > { %p612_p6 = pneg %p611_p4 }
  0x81   : > { %p618_p7 = por %p617_p5, %p616_p10 }
  0x83   : > { %p619_p9 = pnand %p618_p7, %p612_p6 }
  0x85   : > { %622 = shalt.err (!%p619_p9)
}
  0x86   : > { %453 = dma.vmem_to_hbm [thread:$0]  (%p965_p1), %s882_s4, 128, %s887_s22, %s271_s16  }
  0x87 PF: > { %s314_s9 = sand.u32 1, %s657_s12   ;;  %p966_p11 = scmp.ne.s32.totalorder %s961_s25, 0 }
  0x88   : > { %p967_p3 = scmp.ge.s32.totalorder %s669_s15, 2  ;;  %s315_s10 = scalar_lea.sflag [#allocation4], %s314_s9 }
  0x8a   : > { %p465_p8 = pnand %p967_p3, %p966_p11 }
  0x8c   : > { %648 = dma.done.wait (!%p465_p8), %s315_s10, 128  }
  0x8d   : > { %650 = vsyncadd (!%p465_p8), %s315_s10, 4294967168  ;;  %s324_s23 = scalar_lea.sflag [#allocation9], %s314_s9 }
  0x8e   : > { %652 = dma.done.wait (!%p465_p8), %s324_s23, 128  }
  0x8f   : > { %654 = vsyncadd (!%p465_p8), %s324_s23, 4294967168  ;;  %p23_p1 = scmp.ge.s32.totalorder %s722_s18, 4   ;;  %s968_s12 = smov %s661_s13 }
  0x90   : > { %s969_s13 = smov %s665_s14  ;;  %s970_s14 = smov %s734_s21 }
  0x91   : > { %s971_s15 = smov %s722_s18  ;;  %25 = sbr.rel (!%p23_p1) target bundleno = 9 (0x9), region = 103 }
  0x98   :  { %329 = vsyncpa [#allocation3], 1 }
  0x99   :  { %331 = vsyncpa [#allocation3 + $0x1], 1 }
  0x9a   :  { %332 = vsyncpa [#allocation6], 1 }
  0x9b   :  { %334 = vsyncpa [#allocation6 + $0x1], 1 }
  0x9c   :  { %335 = vsyncpa [#allocation4], 1 }
  0x9d   :  { %337 = vsyncpa [#allocation4 + $0x1], 1 }
  0x9e   :  { %338 = vsyncpa [#allocation9], 1 }
  0x9f   :  { %340 = vsyncpa [#allocation9 + $0x1], 1 }

</bundles_post_ra>
